<compile_context>
chip_gen: v6e
topology: v6e:2x2x1
jax: 0.10.0
libtpu: 0.0.40
codegen_flags: <defaults>
</compile_context>

<pallas_src>
import jax
import jax.numpy as jnp
from jax.experimental import pallas as pl
from jax.experimental.pallas import tpu as pltpu


def _round_up(x, m):
    return ((x + m - 1) // m) * m


def _pick_tile(dim, target):
    """`dim` is a multiple of 128: return the largest multiple of 128 that
    divides `dim` and is <= target (or `dim` itself when dim <= target)."""
    if dim <= target:
        return dim
    t = (target // 128) * 128
    while dim % t != 0:
        t -= 128
    return t


def _choose_m_tiling(M, cap=512):
    """Return (m_pad, tm) with tm dividing m_pad and bounded padding waste."""
    if M <= cap:
        m_pad = _round_up(M, 8)
        return m_pad, m_pad
    m_pad = _round_up(M, 256)
    tm = cap if m_pad % cap == 0 else 256
    return m_pad, tm


# ----------------------------- kernels -----------------------------

def _mm_bias_kernel(x_ref, w_ref, b_ref, o_ref):
    # Full-K block: single MXU dot + f32 bias straight to the output tile.
    o_ref[...] = (
        jnp.dot(x_ref[...], w_ref[...], preferred_element_type=jnp.float32)
        + b_ref[...]
    )


def _mm_bias_kernel_ktiled(x_ref, w_ref, b_ref, o_ref):
    # K-tiled: accumulate directly into the resident f32 output block
    # (output index_map ignores k).  Bias folded into the k == 0 init.
    @pl.when(pl.program_id(2) == 0)
    def _():
        o_ref[...] = jnp.broadcast_to(b_ref[...], o_ref.shape)

    o_ref[...] += jnp.dot(
        x_ref[...], w_ref[...], preferred_element_type=jnp.float32)


def _pallas_dense(x2d, w_t, b2d, *, tm, tn, tk):
    """x2d: (M, K) bf16, w_t: (K, N) bf16, b2d: (1, N) f32 -> (M, N) f32.
    M % tm == 0, K % tk == 0, N % tn == 0 (caller pads)."""
    M, K = x2d.shape
    N = w_t.shape[1]
    m_grid, n_grid, k_grid = M // tm, N // tn, K // tk

    flops = 2 * M * K * N
    bytes_accessed = (
        M * K * 2 * n_grid        # x re-streamed once per N tile
        + K * N * 2 * m_grid      # w re-streamed once per M tile
        + N * 4 * m_grid          # bias
        + M * N * 4               # output writeback
    )
    cost = pl.CostEstimate(flops=flops, transcendentals=0,
                           bytes_accessed=bytes_accessed)

    if k_grid == 1:
        grid = (m_grid, n_grid)
        kernel = _mm_bias_kernel
        in_specs = [
            pl.BlockSpec((tm, K), lambda i, j: (i, 0)),
            pl.BlockSpec((K, tn), lambda i, j: (0, j)),
            pl.BlockSpec((1, tn), lambda i, j: (0, j)),
        ]
        out_specs = pl.BlockSpec((tm, tn), lambda i, j: (i, j))
        semantics = ("parallel", "parallel")
    else:
        grid = (m_grid, n_grid, k_grid)
        kernel = _mm_bias_kernel_ktiled
        in_specs = [
            pl.BlockSpec((tm, tk), lambda i, j, k: (i, k)),
            pl.BlockSpec((tk, tn), lambda i, j, k: (k, j)),
            pl.BlockSpec((1, tn), lambda i, j, k: (0, j)),
        ]
        out_specs = pl.BlockSpec((tm, tn), lambda i, j, k: (i, j))
        semantics = ("parallel", "parallel", "arbitrary")

    return pl.pallas_call(
        kernel,
        out_shape=jax.ShapeDtypeStruct((M, N), jnp.float32),
        grid_spec=pltpu.PrefetchScalarGridSpec(
            num_scalar_prefetch=0,
            grid=grid,
            in_specs=in_specs,
            out_specs=out_specs,
        ),
        compiler_params=pltpu.CompilerParams(
            dimension_semantics=semantics,
            # > worst-case ~16 MiB working set; lifts v5e's 16 MiB default,
            # stays safely inside v7x's 64 MiB physical / 32 MiB scoped VMEM.
            vmem_limit_bytes=32 * 1024 * 1024,
        ),
        cost_estimate=cost,
    )(x2d, w_t, b2d)


# ----------------------------- module -----------------------------

class SparseDimensionsLinearJax:
    """JAX/Pallas equivalent of nn_pruning SparseDimensionsLinear.forward."""

    def __init__(self, in_features, out_features, weight, bias,
                 input_extract, output_expand, *,
                 tk_target=2048, tn_target=1024):
        self.in_features = int(in_features)
        self.out_features = int(out_features)

        self.input_extract = (None if input_extract is None
                              else jnp.asarray(input_extract, jnp.int32))
        self.output_expand = (None if output_expand is None
                              else jnp.asarray(output_expand, jnp.int32))

        weight = jnp.asarray(weight, jnp.float32)   # (N_red, K_red)
        bias = jnp.asarray(bias, jnp.float32)       # (N_red,)
        n_red, k_red = weight.shape
        self.n_red, self.k_red = int(n_red), int(k_red)

        # Zero-pad the COMPACT weight/bias to lane-aligned (128) sizes.  The
        # sparsity is NOT folded back to full width: the matmul runs at the
        # pruned sizes, the scatter happens outside the kernel.
        self.k_pad = _round_up(self.k_red, 128)
        self.n_pad = _round_up(self.n_red, 128)

        w_t = jnp.zeros((self.k_pad, self.n_pad), jnp.float32)
        w_t = w_t.at[:self.k_red, :self.n_red].set(weight.T)
        # TODO(synk): on v7x an fp8 weight (per-channel scale folded into the
        # f32 bias epilogue) would halve weight bandwidth again; quality-gated.
        self.w_t = w_t.astype(jnp.bfloat16)          # (K_pad, N_pad) bf16

        b2d = jnp.zeros((1, self.n_pad), jnp.float32)
        self.b2d = b2d.at[0, :self.n_red].set(bias)  # (1, N_pad) f32

        # Static, lane-aligned tiles.  Full-K when k_pad <= tk_target, which
        # removes the K grid axis (and all accumulator traffic) entirely.
        self.tk = _pick_tile(self.k_pad, tk_target)
        self.tn = _pick_tile(self.n_pad, tn_target)

        self._fwd = jax.jit(self._forward)

    def _forward(self, batch):
        lead = batch.shape[:-1]
        x2d = batch.reshape(-1, batch.shape[-1])
        M = x2d.shape[0]
        if M == 0:                                   # empty batch guard
            return jnp.zeros((*lead, self.out_features), jnp.float32)

        # 1) gather kept input columns (dropped, not zero-multiplied), cast to
        #    bf16 once, zero-pad K/M.  Under jit these fuse into one pass.
        if self.input_extract is not None:
            x2d = x2d[:, self.input_extract]         # (M, k_red)
        x2d = x2d.astype(jnp.bfloat16)

        m_pad, tm = _choose_m_tiling(M)
        pad_m = m_pad - M
        pad_k = self.k_pad - self.k_red
        if pad_m or pad_k:
            x2d = jnp.pad(x2d, ((0, pad_m), (0, pad_k)))

        # 2) compact dense matmul + bias on the MXU.
        y = _pallas_dense(x2d, self.w_t, self.b2d,
                          tm=tm, tn=self.tn, tk=self.tk)  # (m_pad, n_pad) f32
        y = y[:M, :self.n_red]

        # 3) scatter back into a zero tensor of width out_features.
        if self.output_expand is not None:
            out = jnp.zeros((M, self.out_features), jnp.float32)
            out = out.at[:, self.output_expand].set(y)
        else:
            out = y
        return out.reshape(*lead, self.out_features)

    def __call__(self, batch):
        return self._fwd(batch)


# ----------------------------- tests -----------------------------

if __name__ == "__main__":
    key = jax.random.PRNGKey(0)
    kw, kb, kx, kw2, kb2, kx2 = jax.random.split(key, 6)

    # --- Test 1: small module shapes, full-K (no K grid axis) path ---------
    batch_size, seq_len = 2, 8
    in_features, out_features = 32, 32
    # keep input columns NOT multiples of 4 -> 24 of 32
    input_extract = jnp.array(
        [i for i in range(in_features) if i % 4 != 0], dtype=jnp.int32)
    # keep even output rows -> 16 of 32
    output_expand = jnp.array(
        [i for i in range(out_features) if i % 2 == 0], dtype=jnp.int32)
    k_red = input_extract.shape[0]
    n_red = output_expand.shape[0]

    weight = jax.random.normal(kw, (n_red, k_red), dtype=jnp.float32) * 0.05
    bias = jax.random.normal(kb, (n_red,), dtype=jnp.float32) * 0.1

    module = SparseDimensionsLinearJax(
        in_features, out_features, weight, bias, input_extract, output_expand)

    x = jax.random.normal(kx, (batch_size, seq_len, in_features),
                          dtype=jnp.float32)
    out = jax.block_until_ready(module(x))

    # Reference: gather -> linear -> scatter in f32.
    ref_red = x[..., input_extract] @ weight.T + bias
    ref = jnp.zeros((batch_size, seq_len, out_features), dtype=jnp.float32)
    ref = ref.at[..., output_expand].set(ref_red)

    assert out.shape == (batch_size, seq_len, out_features)
    # bf16 MXU feed + f32 accumulation -> loose tolerance vs f32 reference.
    assert jnp.allclose(out, ref, atol=3e-2, rtol=3e-2)
    # Pruned output positions must be EXACTLY zero.
    pruned = jnp.array(
        [i for i in range(out_features) if i % 2 == 1], dtype=jnp.int32)
    assert jnp.all(out[..., pruned] == 0.0)

    # --- Test 2: small tile targets force the K-tiled / N-tiled kernel -----
    in2, out2 = 256, 384
    out_expand2 = jnp.arange(0, out2, 2, dtype=jnp.int32)   # 192 outputs kept
    n2 = out_expand2.shape[0]
    weight2 = jax.random.normal(kw2, (n2, in2), dtype=jnp.float32) * 0.03
    bias2 = jax.random.normal(kb2, (n2,), dtype=jnp.float32) * 0.1

    module2 = SparseDimensionsLinearJax(
        in2, out2, weight2, bias2, None, out_expand2,
        tk_target=128, tn_target=128)          # -> grid (1, 2, 2), K-tiled
    x2 = jax.random.normal(kx2, (4, 96, in2), dtype=jnp.float32)
    out_2 = jax.block_until_ready(module2(x2))

    ref2_red = x2 @ weight2.T + bias2
    ref2 = jnp.zeros((4, 96, out2), dtype=jnp.float32)
    ref2 = ref2.at[..., out_expand2].set(ref2_red)

    assert out_2.shape == (4, 96, out2)
    assert jnp.allclose(out_2, ref2, atol=5e-2, rtol=5e-2)

    print("KERNEL_OK")
</pallas_src>

<mosaic_0001>
module attributes {stable_mosaic.version = 11 : i64} {
  func.func @_mm_bias_kernel(%arg0: i32, %arg1: i32, %arg2: memref<16x128xbf16, #tpu.memory_space<vmem>>, %arg3: memref<128x128xbf16, #tpu.memory_space<vmem>>, %arg4: memref<1x128xf32, #tpu.memory_space<vmem>>, %arg5: memref<16x128xf32, #tpu.memory_space<vmem>>) attributes {dimension_semantics = [#tpu.dimension_semantics<parallel>, #tpu.dimension_semantics<parallel>], iteration_bounds = array<i64: 1, 1>, scalar_prefetch = 0 : i64, scratch_operands = 0 : i64, tpu.core_type = #tpu.core_type<tc>, window_params = [{transform_indices = @transform_0, window_bounds = array<i64: 16, 128>}, {transform_indices = @transform_1, window_bounds = array<i64: 128, 128>}, {transform_indices = @transform_2, window_bounds = array<i64: 1, 128>}, {transform_indices = @transform_3, window_bounds = array<i64: 16, 128>}]} {
    %c0 = arith.constant 0 : index
    %c0_0 = arith.constant 0 : index
    %0 = vector.load %arg2[%c0, %c0_0] : memref<16x128xbf16, #tpu.memory_space<vmem>>, vector<16x128xbf16>
    %c0_1 = arith.constant 0 : index
    %c0_2 = arith.constant 0 : index
    %1 = vector.load %arg3[%c0_1, %c0_2] : memref<128x128xbf16, #tpu.memory_space<vmem>>, vector<128x128xbf16>
    %cst = arith.constant dense<0.000000e+00> : vector<16x128xf32>
    %2 = tpu.matmul %0, %1, %cst {dimension_numbers = #tpu.dot_dimension_numbers<[1], [0], [0], [1], [0, 0, 1, 1], [], []>} : vector<16x128xbf16>, vector<128x128xbf16>, vector<16x128xf32> -> vector<16x128xf32>
    %c0_3 = arith.constant 0 : index
    %c0_4 = arith.constant 0 : index
    %3 = vector.load %arg4[%c0_3, %c0_4] : memref<1x128xf32, #tpu.memory_space<vmem>>, vector<1x128xf32>
    %4 = vector.broadcast %3 : vector<1x128xf32> to vector<16x128xf32>
    %5 = arith.addf %2, %4 : vector<16x128xf32>
    %c0_5 = arith.constant 0 : index
    %c0_6 = arith.constant 0 : index
    %6 = vector.load %arg5[%c0_5, %c0_6] : memref<16x128xf32, #tpu.memory_space<vmem>>, vector<16x128xf32>
    tpu.vector_store %arg5[%c0_5, %c0_6], %5 {strides = array<i32>} : memref<16x128xf32, #tpu.memory_space<vmem>>, vector<16x128xf32>,
    return
  }
  func.func @transform_0(%arg0: i32, %arg1: i32) -> (i32, i32) {
    %c0_i32 = arith.constant 0 : i32
    %c0_i32_0 = arith.constant 0 : i32
    return %arg0, %c0_i32 : i32, i32
  }
  func.func @transform_1(%arg0: i32, %arg1: i32) -> (i32, i32) {
    %c0_i32 = arith.constant 0 : i32
    %c0_i32_0 = arith.constant 0 : i32
    return %c0_i32, %arg1 : i32, i32
  }
  func.func @transform_2(%arg0: i32, %arg1: i32) -> (i32, i32) {
    %c0_i32 = arith.constant 0 : i32
    %c0_i32_0 = arith.constant 0 : i32
    return %c0_i32, %arg1 : i32, i32
  }
  func.func @transform_3(%arg0: i32, %arg1: i32) -> (i32, i32) {
    %c0_i32 = arith.constant 0 : i32
    return %arg0, %arg1 : i32, i32
  }
}

</mosaic_0001>

<bundles_post_ra>
// kernel: _forward.1
= control target key start
LH: loop header
LB: loop body
LE: loop exit
PB: predicated region body
PF: predicated region fallthrough
CT: control target
= control target key end

     0   :  { %v191_v0 = vmov 0.0   ;;  %vm192_vm0 = vmmov 0   ;;  %s249_s1 = inlined_call_operand.vmem [shape: bf16[128,128], index: 1, kind: input, shape index: {}]   ;;  %s250_s0 = inlined_call_operand.vmem [shape: bf16[16,128], index: 0, kind: input, shape index: {}]   ;;  %s251_s2 = inlined_call_operand.vmem [shape: f32[1,128], index: 2, kind: input, shape index: {}]   ;;  %s252_s3 = inlined_call_operand.vmem [shape: f32[16,128], index: 3, kind: output, shape index: {}]  }
   0x1   :  { %160 = vmatprep.subr.bf16.mxu0 %v191_v0  ;;  %v182_v1 = vld [vmem:[%s249_s1 + $0x38] sm:$0xff]   ;;  %176 = vmatprep.mubr.msk.bf16.mxu0 %vm192_vm0, %v191_v0  ;;  %v183_v2 = vld [vmem:[%s249_s1 + $0x30] sm:$0xff]   ;;  %v184_v3 = vld [vmem:[%s249_s1 + $0x28] sm:$0xff]  }
   0x2   :  { %161 = vmatpush3.bf16.msra.mxu0 %v182_v1  ;;  %v185_v4 = vld [vmem:[%s249_s1 + $0x20] sm:$0xff]   ;;  %v186_v5 = vld [vmem:[%s249_s1 + $0x18] sm:$0xff]   ;;  %v187_v6 = vld [vmem:[%s249_s1 + $0x10] sm:$0xff]  }
   0x3   :  { %162 = vmatprep.subr.bf16.mxu0 %v191_v0  ;;  %v188_v7 = vld [vmem:[%s249_s1 + $0x8] sm:$0xff]   ;;  %v189_v8 = vld [vmem:[%s249_s1] sm:$0xff]  }
   0x4   :  { %v190_v9 = vld [vmem:[%s250_s0] sm:$0xff]  }
   0x5   :  { %v141_v10 = vld [vmem:[%s251_s2] ss:$0 sm:$0xff] }
   0x6   :  { %163 = vmatpush3.bf16.msra.mxu0 %v183_v2 }
   0x7   :  { %164 = vmatprep.subr.bf16.mxu0 %v191_v0 }
   0xa   :  { %165 = vmatpush3.bf16.msra.mxu0 %v184_v3 }
   0xb   :  { %166 = vmatprep.subr.bf16.mxu0 %v191_v0 }
   0xe   :  { %167 = vmatpush3.bf16.msra.mxu0 %v185_v4 }
   0xf   :  { %168 = vmatprep.subr.bf16.mxu0 %v191_v0 }
  0x12   :  { %169 = vmatpush3.bf16.msra.mxu0 %v186_v5 }
  0x13   :  { %170 = vmatprep.subr.bf16.mxu0 %v191_v0 }
  0x16   :  { %171 = vmatpush3.bf16.msra.mxu0 %v187_v6 }
  0x17   :  { %172 = vmatprep.subr.bf16.mxu0 %v191_v0 }
  0x1a   :  { %173 = vmatpush3.bf16.msra.mxu0 %v188_v7 }
  0x1b   :  { %174 = vmatprep.subr.bf16.mxu0 %v191_v0 }
  0x1e   :  { %175 = vmatpush3.bf16.msra.mxu0 %v189_v8 }
  0x21   :  { %177 = vmatmul.mubr.bf16.vlgmr.msra.gmra.mxu0 %v190_v9 }
  0xe1   :  { %v128_v11 = vpop.f32.mrf.mxu0 }
  0xe2   :  { %v129_v12 = vadd.f32 %v141_v10, %v128_v11 }
  0xe3   :  { %v178_v13 = vpop.f32.mrf.mxu0 }
  0xe4   :  { %135 = vst [vmem:[%s252_s3] sm:$0xff] %v129_v12 }
  0xe5   :  { %v131_v14 = vpop.f32.mrf.mxu0 }
  0xe6   :  { %v132_v15 = vadd.f32 %v141_v10, %v131_v14 }
  0xe7   :  { %v179_v16 = vpop.f32.mrf.mxu0 }
  0xe8   :  { %136 = vst [vmem:[%s252_s3 + $0x8] sm:$0xff] %v132_v15 }

</bundles_post_ra>
